<compile_context>
chip_gen: v7x
topology: tpu7x:2x2x1
jax: 0.10.0
libtpu: 0.0.40
codegen_flags: <defaults>
</compile_context>

<pallas_src>
import functools

import jax
import jax.numpy as jnp
from jax.experimental import pallas as pl
from jax.experimental.pallas import tpu as pltpu


# ---------------------------------------------------------------------------
# Packed-parameter layout helpers (shared by the host-side packer and the kernel).
# ---------------------------------------------------------------------------
def _ru8(x):
    return ((x + 7) // 8) * 8


def _param_layout(c_in, h, d):
    """Row offsets of each weight block inside the packed (rows, lanes) buffer."""
    lanes = max(h, 2 * d, 8)
    offs = {}
    r = 0
    for name, nrows in (("W1", c_in), ("W2", h), ("Hw1", h), ("Hw2", 2 * d), ("Hw3", 2 * d)):
        offs[name] = r
        r += _ru8(nrows)
    return offs, r, lanes


def pack_params(params, c_in, h, d):
    """Merge the Phi/Theta heads and pack every weight/bias into two buffers."""
    offs, total_rows, lanes = _param_layout(c_in, h, d)
    f32 = jnp.float32

    # Merged head layer 1: concat along the output (lane) axis.
    Hw1 = jnp.concatenate([params["pw1"], params["tw1"]], axis=1)          # (h, 2d)
    # Merged head layers 2/3: block-diagonal so the two heads stay independent.
    Hw2 = jnp.zeros((2 * d, 2 * d), f32)
    Hw2 = Hw2.at[0:d, 0:d].set(params["pw2"]).at[d:2 * d, d:2 * d].set(params["tw2"])
    Hw3 = jnp.zeros((2 * d, 4), f32)
    Hw3 = Hw3.at[0:d, 0:2].set(params["pw3"]).at[d:2 * d, 2:4].set(params["tw3"])

    Wbuf = jnp.zeros((total_rows, lanes), f32)

    def place(buf, row, w):
        return buf.at[row:row + w.shape[0], 0:w.shape[1]].set(w.astype(f32))

    Wbuf = place(Wbuf, offs["W1"], params["W1"])
    Wbuf = place(Wbuf, offs["W2"], params["W2"])
    Wbuf = place(Wbuf, offs["Hw1"], Hw1)
    Wbuf = place(Wbuf, offs["Hw2"], Hw2)
    Wbuf = place(Wbuf, offs["Hw3"], Hw3)

    # Biases: one lane-packed row vector.
    nb = 2 * h + 4 * d + 4
    blanes = ((nb + 127) // 128) * 128
    Hb1 = jnp.concatenate([params["pb1"], params["tb1"]], axis=1)          # (1, 2d)
    Hb2 = jnp.concatenate([params["pb2"], params["tb2"]], axis=1)          # (1, 2d)
    Hb3 = jnp.concatenate([params["pb3"], params["tb3"]], axis=1)          # (1, 4)
    Bbuf = jnp.zeros((1, blanes), f32)
    Bbuf = Bbuf.at[:, 0:h].set(params["b1"].astype(f32))
    Bbuf = Bbuf.at[:, h:2 * h].set(params["b2"].astype(f32))
    Bbuf = Bbuf.at[:, 2 * h:2 * h + 2 * d].set(Hb1.astype(f32))
    Bbuf = Bbuf.at[:, 2 * h + 2 * d:2 * h + 4 * d].set(Hb2.astype(f32))
    Bbuf = Bbuf.at[:, 2 * h + 4 * d:2 * h + 4 * d + 4].set(Hb3.astype(f32))

    offs_tuple = (offs["W1"], offs["W2"], offs["Hw1"], offs["Hw2"], offs["Hw3"])
    return Wbuf, Bbuf, offs_tuple


# ---------------------------------------------------------------------------
# gcn_norm glue (what PyG GCNConv does by default: add_remaining_self_loops(fill=1)
# followed by symmetric D^-1/2 (A+I) D^-1/2 with degree over the target index).
# ---------------------------------------------------------------------------
def gcn_norm_dense_adj(edge_index, edge_weight, num_nodes, dtype=jnp.float32):
    N = num_nodes
    src = edge_index[0].astype(jnp.int32)
    dst = edge_index[1].astype(jnp.int32)
    w = edge_weight.astype(dtype)

    non_loop = src != dst
    # Self-loop weight defaults to 1; existing self-loop weights are preserved.
    self_idx = jnp.where(non_loop, N, dst)                 # out-of-bounds -> dropped
    loop_w = jnp.ones((N,), dtype).at[self_idx].set(w, mode="drop")
    w_nl = jnp.where(non_loop, w, jnp.zeros_like(w))       # original self loops removed

    # Weighted in-degree (target / col index, flow='source_to_target'), incl. self loops.
    deg = jnp.zeros((N,), dtype).at[dst].add(w_nl) + loop_w
    dinv = jnp.where(deg > 0, jax.lax.rsqrt(deg), jnp.zeros_like(deg))

    norm_nl = dinv[src] * w_nl * dinv[dst]
    A = jnp.zeros((N, N), dtype).at[dst, src].add(norm_nl)
    A = A + jnp.diag(dinv * dinv * loop_w)
    return A


# ---------------------------------------------------------------------------
# Pallas kernel: full forward pass given the densified adjacency + packed params.
# ---------------------------------------------------------------------------
def model_kernel(A_ref, X_ref, P_ref, W_ref, B_ref, out_ref, *, c_in, h, d, offs):
    o_w1, o_w2, o_hw1, o_hw2, o_hw3 = offs
    f32, bf16 = jnp.float32, jnp.bfloat16

    A = A_ref[...]                                   # (N, N) bf16
    W = W_ref[...]                                   # packed weights, f32
    B = B_ref[...]                                   # packed biases, f32

    W1 = W[o_w1:o_w1 + c_in, 0:h]                    # (c_in, h)
    W2 = W[o_w2:o_w2 + h, 0:h]                       # (h, h)
    Hw1 = W[o_hw1:o_hw1 + h, 0:2 * d]                # (h, 2d)   concat(Phi1, Theta1)
    Hw2 = W[o_hw2:o_hw2 + 2 * d, 0:2 * d]            # (2d, 2d)  blockdiag(Phi2, Theta2)
    Hw3 = W[o_hw3:o_hw3 + 2 * d, 0:4]                # (2d, 4)   blockdiag(Phi3, Theta3)

    b1 = B[:, 0:h]
    b2 = B[:, h:2 * h]
    Hb1 = B[:, 2 * h:2 * h + 2 * d]
    Hb2 = B[:, 2 * h + 2 * d:2 * h + 4 * d]
    Hb3 = B[:, 2 * h + 4 * d:2 * h + 4 * d + 4]

    def leaky(x):                                    # nn.LeakyReLU default slope = 0.01
        return jnp.where(x > 0, x, 0.01 * x)

    # GCN layer 1: propagate (bf16 MXU, f32 acc) then transform + bias.
    ax = jnp.dot(A, X_ref[...].astype(bf16), preferred_element_type=f32)     # (N, c_in)
    h1 = leaky(jnp.dot(ax, W1, preferred_element_type=f32) + b1)             # (N, h)

    # GCN layer 2.
    ah = jnp.dot(A, h1.astype(bf16), preferred_element_type=f32)             # (N, h)
    h2 = leaky(jnp.dot(ah, W2, preferred_element_type=f32) + b2)             # (N, h)

    # global_mean_pool as a (G, N) x (N, h) matmul.
    g = jnp.dot(P_ref[...], h2, preferred_element_type=f32)                  # (G, h)

    # Merged Phi/Theta MLP heads; columns [0:2]=Phi, [2:4]=Theta -> direct out_ref write.
    z = leaky(jnp.dot(g, Hw1, preferred_element_type=f32) + Hb1)             # (G, 2d)
    z = leaky(jnp.dot(z, Hw2, preferred_element_type=f32) + Hb2)             # (G, 2d)
    out_ref[...] = (jnp.dot(z, Hw3, preferred_element_type=f32) + Hb3).astype(out_ref.dtype)


# ---------------------------------------------------------------------------
# Wrapper: preprocessing glue + one pallas_call.
# ---------------------------------------------------------------------------
def model_1_0_forward(X, edge_index, edge_weight, batching, params, num_graphs,
                      in_channels=3, gcn_nodes=16, dense_nodes=16):
    N = X.shape[0]
    G = num_graphs
    c_in, h, d = in_channels, gcn_nodes, dense_nodes

    # Normalized dense adjacency (bf16: normalized weights <= 1, halves VMEM/DMA for A).
    A = gcn_norm_dense_adj(edge_index, edge_weight, N, jnp.float32).astype(jnp.bfloat16)

    # global_mean_pool matrix. TODO(synk): cache P if `batching` is static across steps.
    one_hot = (batching[None, :] == jnp.arange(G)[:, None]).astype(jnp.float32)
    counts = jnp.maximum(one_hot.sum(axis=1, keepdims=True), 1.0)
    P = one_hot / counts

    Wbuf, Bbuf, offs = pack_params(params, c_in, h, d)

    inputs = (A, X.astype(jnp.float32), P, Wbuf, Bbuf)

    total_bytes = sum(int(a.size) * a.dtype.itemsize for a in inputs) + G * 4 * 4
    vmem_limit = int(min(96 * 1024 * 1024, max(16 * 1024 * 1024, 4 * total_bytes)))

    flops = (2 * N * N * (c_in + h)                          # two propagations
             + 2 * N * (c_in * h + h * h)                    # weight transforms
             + 2 * G * N * h                                 # mean pool
             + 2 * G * (h * 2 * d + 4 * d * d + 2 * d * 4))  # merged heads

    kernel = functools.partial(model_kernel, c_in=c_in, h=h, d=d, offs=offs)

    return pl.pallas_call(
        kernel,
        out_shape=jax.ShapeDtypeStruct((G, 4), jnp.float32),
        in_specs=[pl.BlockSpec(memory_space=pltpu.MemorySpace.VMEM)] * len(inputs),
        out_specs=pl.BlockSpec(memory_space=pltpu.MemorySpace.VMEM),
        compiler_params=pltpu.CompilerParams(vmem_limit_bytes=vmem_limit),
        cost_estimate=pl.CostEstimate(flops=int(flops), transcendentals=0,
                                      bytes_accessed=int(total_bytes)),
    )(*inputs)


# ---------------------------------------------------------------------------
# Deterministic parameter init (shapes match Model_1_0.__init__; (in, out) convention).
# ---------------------------------------------------------------------------
def init_params(key, in_channels=3, gcn_nodes=16, dense_nodes=16):
    ks = jax.random.split(key, 16)

    def w(k, shape):
        return (0.1 * jax.random.normal(k, shape)).astype(jnp.float32)

    return dict(
        # GCNConv: one weight matrix + bias per layer.
        W1=w(ks[0], (in_channels, gcn_nodes)), b1=w(ks[1], (1, gcn_nodes)),
        W2=w(ks[2], (gcn_nodes, gcn_nodes)),   b2=w(ks[3], (1, gcn_nodes)),
        # Phi head
        pw1=w(ks[4], (gcn_nodes, dense_nodes)),   pb1=w(ks[5], (1, dense_nodes)),
        pw2=w(ks[6], (dense_nodes, dense_nodes)), pb2=w(ks[7], (1, dense_nodes)),
        pw3=w(ks[8], (dense_nodes, 2)),           pb3=w(ks[9], (1, 2)),
        # Theta head
        tw1=w(ks[10], (gcn_nodes, dense_nodes)),   tb1=w(ks[11], (1, dense_nodes)),
        tw2=w(ks[12], (dense_nodes, dense_nodes)), tb2=w(ks[13], (1, dense_nodes)),
        tw3=w(ks[14], (dense_nodes, 2)),           tb3=w(ks[15], (1, 2)),
    )


# Pure-JAX reference of the PyTorch forward (f32 throughout), for validation.
def reference_forward(X, edge_index, edge_weight, batching, params, num_graphs):
    N = X.shape[0]
    A = gcn_norm_dense_adj(edge_index, edge_weight, N, jnp.float32)
    leaky = lambda x: jnp.where(x > 0, x, 0.01 * x)
    out = leaky(A @ (X @ params["W1"]) + params["b1"])
    out = leaky(A @ (out @ params["W2"]) + params["b2"])
    one_hot = (batching[None, :] == jnp.arange(num_graphs)[:, None]).astype(jnp.float32)
    P = one_hot / jnp.maximum(one_hot.sum(axis=1, keepdims=True), 1.0)
    g = P @ out
    phi = leaky(g @ params["pw1"] + params["pb1"])
    phi = leaky(phi @ params["pw2"] + params["pb2"])
    phi = phi @ params["pw3"] + params["pb3"]
    th = leaky(g @ params["tw1"] + params["tb1"])
    th = leaky(th @ params["tw2"] + params["tb2"])
    th = th @ params["tw3"] + params["tb3"]
    return jnp.concatenate([phi, th], axis=1)


if __name__ == "__main__":
    key = jax.random.PRNGKey(0)
    k_x, k_ei, k_ew, k_p = jax.random.split(key, 4)

    N, E, C_IN, NUM_GRAPHS = 8, 12, 3, 2

    X = jax.random.normal(k_x, (N, C_IN), dtype=jnp.float32)
    edge_index = jax.random.randint(k_ei, (2, E), 0, N, dtype=jnp.int32)
    edge_weight = jax.random.uniform(k_ew, (E,), dtype=jnp.float32) + 0.1
    batching = jnp.array([0, 0, 0, 0, 1, 1, 1, 1], dtype=jnp.int32)

    params = init_params(k_p, in_channels=C_IN, gcn_nodes=16, dense_nodes=16)

    out = model_1_0_forward(X, edge_index, edge_weight, batching, params,
                            num_graphs=NUM_GRAPHS, in_channels=C_IN,
                            gcn_nodes=16, dense_nodes=16)
    out = jax.block_until_ready(out)

    ref = reference_forward(X, edge_index, edge_weight, batching, params, NUM_GRAPHS)

    assert out.shape == (NUM_GRAPHS, 4), out.shape
    assert bool(jnp.all(jnp.isfinite(out)))
    assert bool(jnp.allclose(out, ref, rtol=5e-2, atol=2e-2)), (out, ref)
    print("KERNEL_OK")
</pallas_src>

<mosaic_0001>
module attributes {stable_mosaic.version = 11 : i64} {
  func.func @model_kernel(%arg0: memref<8x8xbf16, #tpu.memory_space<vmem>>, %arg1: memref<8x3xf32, #tpu.memory_space<vmem>>, %arg2: memref<2x8xf32, #tpu.memory_space<vmem>>, %arg3: memref<104x32xf32, #tpu.memory_space<vmem>>, %arg4: memref<1x128xf32, #tpu.memory_space<vmem>>, %arg5: memref<2x4xf32, #tpu.memory_space<vmem>>) attributes {dimension_semantics = [], scalar_prefetch = 0 : i64, scratch_operands = 0 : i64, tpu.core_type = #tpu.core_type<tc>} {
    %c0 = arith.constant 0 : index
    %c0_0 = arith.constant 0 : index
    %0 = vector.load %arg0[%c0, %c0_0] : memref<8x8xbf16, #tpu.memory_space<vmem>>, vector<8x8xbf16>
    %c0_1 = arith.constant 0 : index
    %c0_2 = arith.constant 0 : index
    %1 = vector.load %arg3[%c0_1, %c0_2] : memref<104x32xf32, #tpu.memory_space<vmem>>, vector<104x32xf32>
    %c0_3 = arith.constant 0 : index
    %c0_4 = arith.constant 0 : index
    %2 = vector.load %arg4[%c0_3, %c0_4] : memref<1x128xf32, #tpu.memory_space<vmem>>, vector<1x128xf32>
    %3 = vector.extract_strided_slice %1 {offsets = [0, 0], sizes = [3, 16], strides = [1, 1]} : vector<104x32xf32> to vector<3x16xf32>
    %4 = vector.extract_strided_slice %1 {offsets = [8, 0], sizes = [16, 16], strides = [1, 1]} : vector<104x32xf32> to vector<16x16xf32>
    %5 = vector.extract_strided_slice %1 {offsets = [24, 0], sizes = [16, 32], strides = [1, 1]} : vector<104x32xf32> to vector<16x32xf32>
    %6 = vector.extract_strided_slice %1 {offsets = [40, 0], sizes = [32, 32], strides = [1, 1]} : vector<104x32xf32> to vector<32x32xf32>
    %7 = vector.extract_strided_slice %1 {offsets = [72, 0], sizes = [32, 4], strides = [1, 1]} : vector<104x32xf32> to vector<32x4xf32>
    %8 = vector.extract_strided_slice %2 {offsets = [0, 0], sizes = [1, 16], strides = [1, 1]} : vector<1x128xf32> to vector<1x16xf32>
    %9 = vector.extract_strided_slice %2 {offsets = [0, 16], sizes = [1, 16], strides = [1, 1]} : vector<1x128xf32> to vector<1x16xf32>
    %10 = vector.extract_strided_slice %2 {offsets = [0, 32], sizes = [1, 32], strides = [1, 1]} : vector<1x128xf32> to vector<1x32xf32>
    %11 = vector.extract_strided_slice %2 {offsets = [0, 64], sizes = [1, 32], strides = [1, 1]} : vector<1x128xf32> to vector<1x32xf32>
    %12 = vector.extract_strided_slice %2 {offsets = [0, 96], sizes = [1, 4], strides = [1, 1]} : vector<1x128xf32> to vector<1x4xf32>
    %c0_5 = arith.constant 0 : index
    %c0_6 = arith.constant 0 : index
    %13 = vector.load %arg1[%c0_5, %c0_6] : memref<8x3xf32, #tpu.memory_space<vmem>>, vector<8x3xf32>
    %14 = arith.truncf %13 : vector<8x3xf32> to vector<8x3xbf16>
    %cst = arith.constant dense<0.000000e+00> : vector<8x3xf32>
    %15 = tpu.matmul %0, %14, %cst {dimension_numbers = #tpu.dot_dimension_numbers<[1], [0], [0], [1], [0, 0, 1, 1], [], []>} : vector<8x8xbf16>, vector<8x3xbf16>, vector<8x3xf32> -> vector<8x3xf32>
    %cst_7 = arith.constant dense<0.000000e+00> : vector<8x16xf32>
    %16 = tpu.matmul %15, %3, %cst_7 {dimension_numbers = #tpu.dot_dimension_numbers<[1], [0], [0], [1], [0, 0, 1, 1], [], []>} : vector<8x3xf32>, vector<3x16xf32>, vector<8x16xf32> -> vector<8x16xf32>
    %17 = vector.broadcast %8 : vector<1x16xf32> to vector<8x16xf32>
    %18 = arith.addf %16, %17 : vector<8x16xf32>
    %cst_8 = arith.constant 0.000000e+00 : f32
    %19 = vector.broadcast %cst_8 : f32 to vector<8x16xf32>
    %20 = arith.cmpf ogt, %18, %19 : vector<8x16xf32>
    %cst_9 = arith.constant 0.00999999977 : f32
    %21 = vector.broadcast %cst_9 : f32 to vector<8x16xf32>
    %22 = arith.mulf %21, %18 : vector<8x16xf32>
    %23 = arith.select %20, %18, %22 : vector<8x16xi1>, vector<8x16xf32>
    %24 = arith.truncf %23 : vector<8x16xf32> to vector<8x16xbf16>
    %cst_10 = arith.constant dense<0.000000e+00> : vector<8x16xf32>
    %25 = tpu.matmul %0, %24, %cst_10 {dimension_numbers = #tpu.dot_dimension_numbers<[1], [0], [0], [1], [0, 0, 1, 1], [], []>} : vector<8x8xbf16>, vector<8x16xbf16>, vector<8x16xf32> -> vector<8x16xf32>
    %cst_11 = arith.constant dense<0.000000e+00> : vector<8x16xf32>
    %26 = tpu.matmul %25, %4, %cst_11 {dimension_numbers = #tpu.dot_dimension_numbers<[1], [0], [0], [1], [0, 0, 1, 1], [], []>} : vector<8x16xf32>, vector<16x16xf32>, vector<8x16xf32> -> vector<8x16xf32>
    %27 = vector.broadcast %9 : vector<1x16xf32> to vector<8x16xf32>
    %28 = arith.addf %26, %27 : vector<8x16xf32>
    %cst_12 = arith.constant 0.000000e+00 : f32
    %29 = vector.broadcast %cst_12 : f32 to vector<8x16xf32>
    %30 = arith.cmpf ogt, %28, %29 : vector<8x16xf32>
    %cst_13 = arith.constant 0.00999999977 : f32
    %31 = vector.broadcast %cst_13 : f32 to vector<8x16xf32>
    %32 = arith.mulf %31, %28 : vector<8x16xf32>
    %33 = arith.select %30, %28, %32 : vector<8x16xi1>, vector<8x16xf32>
    %c0_14 = arith.constant 0 : index
    %c0_15 = arith.constant 0 : index
    %34 = vector.load %arg2[%c0_14, %c0_15] : memref<2x8xf32, #tpu.memory_space<vmem>>, vector<2x8xf32>
    %cst_16 = arith.constant dense<0.000000e+00> : vector<2x16xf32>
    %35 = tpu.matmul %34, %33, %cst_16 {dimension_numbers = #tpu.dot_dimension_numbers<[1], [0], [0], [1], [0, 0, 1, 1], [], []>} : vector<2x8xf32>, vector<8x16xf32>, vector<2x16xf32> -> vector<2x16xf32>
    %cst_17 = arith.constant dense<0.000000e+00> : vector<2x32xf32>
    %36 = tpu.matmul %35, %5, %cst_17 {dimension_numbers = #tpu.dot_dimension_numbers<[1], [0], [0], [1], [0, 0, 1, 1], [], []>} : vector<2x16xf32>, vector<16x32xf32>, vector<2x32xf32> -> vector<2x32xf32>
    %37 = vector.broadcast %10 : vector<1x32xf32> to vector<2x32xf32>
    %38 = arith.addf %36, %37 : vector<2x32xf32>
    %cst_18 = arith.constant 0.000000e+00 : f32
    %39 = vector.broadcast %cst_18 : f32 to vector<2x32xf32>
    %40 = arith.cmpf ogt, %38, %39 : vector<2x32xf32>
    %cst_19 = arith.constant 0.00999999977 : f32
    %41 = vector.broadcast %cst_19 : f32 to vector<2x32xf32>
    %42 = arith.mulf %41, %38 : vector<2x32xf32>
    %43 = arith.select %40, %38, %42 : vector<2x32xi1>, vector<2x32xf32>
    %cst_20 = arith.constant dense<0.000000e+00> : vector<2x32xf32>
    %44 = tpu.matmul %43, %6, %cst_20 {dimension_numbers = #tpu.dot_dimension_numbers<[1], [0], [0], [1], [0, 0, 1, 1], [], []>} : vector<2x32xf32>, vector<32x32xf32>, vector<2x32xf32> -> vector<2x32xf32>
    %45 = vector.broadcast %11 : vector<1x32xf32> to vector<2x32xf32>
    %46 = arith.addf %44, %45 : vector<2x32xf32>
    %cst_21 = arith.constant 0.000000e+00 : f32
    %47 = vector.broadcast %cst_21 : f32 to vector<2x32xf32>
    %48 = arith.cmpf ogt, %46, %47 : vector<2x32xf32>
    %cst_22 = arith.constant 0.00999999977 : f32
    %49 = vector.broadcast %cst_22 : f32 to vector<2x32xf32>
    %50 = arith.mulf %49, %46 : vector<2x32xf32>
    %51 = arith.select %48, %46, %50 : vector<2x32xi1>, vector<2x32xf32>
    %cst_23 = arith.constant dense<0.000000e+00> : vector<2x4xf32>
    %52 = tpu.matmul %51, %7, %cst_23 {dimension_numbers = #tpu.dot_dimension_numbers<[1], [0], [0], [1], [0, 0, 1, 1], [], []>} : vector<2x32xf32>, vector<32x4xf32>, vector<2x4xf32> -> vector<2x4xf32>
    %53 = vector.broadcast %12 : vector<1x4xf32> to vector<2x4xf32>
    %54 = arith.addf %52, %53 : vector<2x4xf32>
    %c0_24 = arith.constant 0 : index
    %c0_25 = arith.constant 0 : index
    %55 = vector.load %arg5[%c0_24, %c0_25] : memref<2x4xf32, #tpu.memory_space<vmem>>, vector<2x4xf32>
    tpu.vector_store %arg5[%c0_24, %c0_25], %54 {strides = array<i32>} : memref<2x4xf32, #tpu.memory_space<vmem>>, vector<2x4xf32>,
    return
  }
}

</mosaic_0001>

<bundles_post_ra>
// kernel: tpu_custom_call.1
= control target key start
LH: loop header
LB: loop body
LE: loop exit
PB: predicated region body
PF: predicated region fallthrough
CT: control target
= control target key end

     0   :  { %vm43_vm0 = vcmask 1043456   ;;  %v765_v1 = vmov 0.0   ;;  %vm766_vm1 = vmmov 0   ;;  %s908_s0 = inlined_call_operand.vmem [shape: bf16[8,8], index: 0, kind: input, shape index: {}]   ;;  %s909_s1 = inlined_call_operand.vmem [shape: f32[8,3], index: 1, kind: input, shape index: {}]   ;;  %s910_s2 = inlined_call_operand.vmem [shape: f32[2,8], index: 2, kind: input, shape index: {}]   ;;  %s911_s3 = inlined_call_operand.vmem [shape: f32[104,32], index: 3, kind: input, shape index: {}]   ;;  %s912_s4 = inlined_call_operand.vmem [shape: f32[1,128], index: 4, kind: input, shape index: {}]   ;;  %s913_s5 = inlined_call_operand.hbm [shape: f32[2,4], index: 5, kind: output, shape index: {}]  }
   0x1   :  { %v37_v0 = vld [vmem:[%s909_s1] sm:$0xff]  ;;  %657 = vmatprep.subr.bf16.mxu0 %v765_v1  ;;  %659 = vmatprep.mubr.msk.bf16.mxu0 %vm766_vm1, %v765_v1 }
   0x2   :  { %v38_v2 = vpack.c.bf16 %v37_v0, %v37_v0 }
   0x3   :  { %10 = vsyncpa [#allocation3], 0  ;;  %663 = vmatprep.subr.mxu1 %v765_v1  ;;  %665 = vmatprep.mubr.msk.f32.mxu1 %vm766_vm1, %v765_v1  ;;  %v22_v4 = vld [vmem:[%s908_s0] sm:$0xf]  ;;  %vm39_vm2 = vcmask 64512   ;;  %vm97_vm3 = vcmask 1042432  }
   0x4   :  { %v45_v3 = vsel %vm43_vm0, %v38_v2, 0  ;;  %v23_v5 = vld [vmem:[%s911_s3] sm:$0xff]  ;;  %vm93_vm4 = vcmask 23552   ;;  %v24_v10 = vld [vmem:[%s911_s3 + $0x8] sm:$0xff]  ;;  %v25_v11 = vld [vmem:[%s911_s3 + $0x10] sm:$0xff]  ;;  %v767_v12 = vmov 0.0|0.0  }
   0x5   :  { %658 = vmatpush3.bf16.msra.mxu0 %v45_v3  ;;  %664 = vmatpush3.msk.msra.mxu1 %vm97_vm3, %v23_v5  ;;  %v716_v13 = vpack.c.bf16 %v25_v11, %v24_v10  ;;  %v836_v14 = vld [vmem:[%s912_s4] ss:$0 sm:$0xff]  ;;  %s768_s4 = smov 112   ;;  %vm221_vm6 = vcmask 130048   ;;  %v26_v26 = vld [vmem:[%s911_s3 + $0x18] sm:$0xff]  ;;  %v28_v36 = vld [vmem:[%s911_s3 + $0x28] sm:$0xff] }
   0x6   :  { %668 = vmatprep.subr.bf16.mxu1 %v765_v1  ;;  %715 = vmatprep.subr.bf16.mxu0 %v767_v12  ;;  %v27_v27 = vld [vmem:[%s911_s3 + $0x20] sm:$0xff]  ;;  %v29_v37 = vld [vmem:[%s911_s3 + $0x30] sm:$0xff]  ;;  %s769_s13 = smov 96   ;;  %v30_v41 = vld [vmem:[%s911_s3 + $0x38] sm:$0xff]  ;;  %s770_s1 = smov 64   ;;  %vm454_vm9 = vcmask 261120  }
   0x7   :  { %218 = vrot.lane.b32.xlu0 %v836_v14, %s768_s4  ;;  %v719_v28 = vpack.c.bf16 %v27_v27, %v26_v26  ;;  %v298_v34 = vld [vmem:[%s910_s2] sm:$0x3]  ;;  %v722_v38 = vpack.c.bf16 %v29_v37, %v28_v36  ;;  %v32_v44 = vld [vmem:[%s911_s3 + $0x48] sm:$0xff]  ;;  %v33_v45 = vld [vmem:[%s911_s3 + $0x50] sm:$0xff]  ;;  %s771_s24 = smov 32   ;;  %s772_s25 = smov [#allocation2]  }
   0x8   :  { %660 = vmatmul.mubr.msk.bf16.vlgmr.msra.gmra.mrb[0].mxu0 %vm39_vm2, %v22_v4  ;;  %v31_v42 = vld [vmem:[%s911_s3 + $0x40] sm:$0xff]  ;;  %451 = vrot.lane.b32.xlu1 %v836_v14, %s770_s1  ;;  %v728_v46 = vpack.c.bf16 %v33_v45, %v32_v44  ;;  %v34_v53 = vld [vmem:[%s911_s3 + $0x58] sm:$0xff]  ;;  %s615_s26 = sshll.u32 %s772_s25, 4  ;;  %vm607_vm11 = vcmask 25600   ;;  %s616_s26 = int_to_ptr.vmem [resolvable:$true] %s615_s26 }
   0x9   :  { %678 = vmatprep.mubr.msk.f32.mxu0 %vm766_vm1, %v765_v1  ;;  %717 = vmatpush3.bf16.msra.mxu0 %v716_v13  ;;  %v725_v43 = vpack.c.bf16 %v31_v42, %v30_v41  ;;  %v35_v54 = vld [vmem:[%s911_s3 + $0x60] sm:$0xff]  ;;  %s741_s3 = scalar_lea.vmem %s616_s26, 32  ;;  %p746_p1 = scmp.lt.s32.totalorder %s616_s26, %s616_s26 }
   0xa   :  { %718 = vmatprep.subr.bf16.mxu0 %v767_v12  ;;  %v731_v55 = vpack.c.bf16 %v35_v54, %v34_v53  ;;  %p742_p0 = scmp.ne.s32.totalorder %s616_s26, %s741_s3  ;;  %p747_p2 = scmp.lt.s32.totalorder %s741_s3, %s741_s3 }
   0xb   :  { %372 = vrot.lane.b32.xlu0 %v836_v14, %s769_s13 }
   0xc   :  { %531 = vrot.lane.b32.xlu1 %v836_v14, %s771_s24  ;;  %p748_p3 = por %p747_p2, %p746_p1 }
   0xe   :  { %p749_p4 = pnand %p748_p3, %p742_p0 }
  0x79   :  { %v219_v29 = vpop.permute.xlu0 %218 }
  0x7a   :  { %v452_v56 = vpop.permute.xlu1 %451 }
  0x7d   :  { %v373_v47 = vpop.permute.xlu0 %372 }
  0x7e   :  { %v532_v62 = vpop.permute.xlu1 %531 }
  0xdb   :  { %v81_v6 = vpop.f32.mrb[0].mxu0 }
  0xdc   :  { %v661_v7 = vpop.f32.mrb[1].mxu0  ;;  %666 = vmatmul.mubr.msk.f32.vlgmr.msra.gmra.mrb[0].mxu1 %vm93_vm4, %v81_v6 }
  0xdd   :  { %v84_v8 = vpop.f32.mrb[2].mxu0  ;;  %670 = vmatprep.mubr.msk.bf16.mxu1 %vm766_vm1, %v765_v1 }
  0xde   :  { %v662_v9 = vpop.f32.mrb[3].mxu0 }
 0x1af   :  { %v167_v15 = vpop.f32.mrb[0].mxu1 }
 0x1b0   :  { %v168_v16 = vadd.f32 %v836_v14, %v167_v15  ;;  %v667_v17 = vpop.f32.mrb[1].mxu1 }
 0x1b2   :  { %vm171_vm5 = vcmp.gt.f32.partialorder %v168_v16, 0.0  ;;  %v172_v18 = vmul.f32 0.01, %v168_v16 }
 0x1b4   :  { %v173_v19 = vsel %vm171_vm5, %v168_v16, %v172_v18 }
 0x1b5   :  { %v174_v20 = vpack.c.bf16 %v173_v19, %v173_v19 }
 0x1b7   :  { %v176_v21 = vsel %vm43_vm0, %v174_v20, 0 }
 0x1b8   :  { %669 = vmatpush3.bf16.msra.mxu1 %v176_v21 }
 0x1b9   :  { %681 = vmatprep.subr.mxu1 %v765_v1 }
 0x1bb   :  { %671 = vmatmul.mubr.msk.bf16.vlgmr.msra.gmra.mrb[4].mxu1 %vm39_vm2, %v22_v4 }
 0x1bc   :  { %683 = vmatprep.mubr.msk.f32.mxu1 %vm766_vm1, %v765_v1 }
 0x28e   :  { %v212_v22 = vpop.f32.mrb[4].mxu1 }
 0x28f   :  { %v672_v23 = vpop.f32.mrb[5].mxu1  ;;  %679 = vmatmul.mubr.msk.f32.vlgmr.msra.gmra.mrb[4].mxu0 %vm221_vm6, %v212_v22 }
 0x290   :  { %v215_v24 = vpop.f32.mrb[6].mxu1  ;;  %690 = vmatprep.mubr.msk.f32.mxu0 %vm766_vm1, %v765_v1  ;;  %720 = vmatpush3.bf16.msra.mxu0 %v719_v28 }
 0x291   :  { %v673_v25 = vpop.f32.mrb[7].mxu1  ;;  %727 = vmatprep.subr.bf16.mxu0 %v767_v12 }
 0x362   :  { %v291_v30 = vpop.f32.mrb[4].mxu0 }
 0x363   :  { %v292_v31 = vadd.f32 %v291_v30, %v219_v29  ;;  %v680_v32 = vpop.f32.mrb[5].mxu0 }
 0x365   :  { %vm295_vm7 = vcmp.gt.f32.partialorder %v292_v31, 0.0  ;;  %v296_v33 = vmul.f32 0.01, %v292_v31 }
 0x367   :  { %v297_v35 = vsel %vm295_vm7, %v292_v31, %v296_v33 }
 0x368   :  { %682 = vmatpush3.msra.mxu1 %v297_v35 }
 0x369   :  { %684 = vmatmul.mubr.msk.f32.vlgmr.msra.gmra.mrb[2].mxu1 %vm39_vm2, %v298_v34  ;;  %721 = vmatprep.subr.bf16.mxu1 %v767_v12 }
 0x36a   :  { %701 = vmatprep.mubr.msk.f32.mxu1 %vm766_vm1, %v765_v1  ;;  %723 = vmatpush3.bf16.msra.mxu1 %v722_v38 }
 0x36b   :  { %724 = vmatprep.subr.bf16.mxu1 %v767_v12 }
 0x36e   :  { %726 = vmatpush3.bf16.msra.mxu1 %v725_v43 }
 0x43c   :  { %v368_v39 = vpop.f32.mrb[2].mxu1 }
 0x43d   :  { %691 = vmatmul.mubr.msk.f32.vlgmr.msra.gmra.mrb[6].mxu0 %vm221_vm6, %v368_v39  ;;  %v685_v40 = vpop.f32.mrb[3].mxu1 }
 0x43e   :  { %712 = vmatprep.mubr.msk.f32.mxu0 %vm766_vm1, %v765_v1  ;;  %729 = vmatpush3.bf16.msra.mxu0 %v728_v46 }
 0x43f   :  { %730 = vmatprep.subr.bf16.mxu0 %v767_v12 }
 0x442   :  { %732 = vmatpush3.bf16.msra.mxu0 %v731_v55 }
 0x510   :  { %v444_v48 = vpop.f32.mrb[6].mxu0 }
 0x511   :  { %v445_v49 = vadd.f32 %v444_v48, %v373_v47  ;;  %v692_v50 = vpop.f32.mrb[7].mxu0 }
 0x513   :  { %vm448_vm8 = vcmp.gt.f32.partialorder %v445_v49, 0.0  ;;  %v449_v51 = vmul.f32 0.01, %v445_v49 }
 0x515   :  { %v450_v52 = vsel %vm448_vm8, %v445_v49, %v449_v51 }
 0x516   :  { %702 = vmatmul.mubr.msk.f32.vlgmr.msra.gmra.mrb[8].mxu1 %vm454_vm9, %v450_v52 }
 0x5e9   :  { %v524_v57 = vpop.f32.mrb[8].mxu1 }
 0x5ea   :  { %v525_v58 = vadd.f32 %v524_v57, %v452_v56  ;;  %v703_v59 = vpop.f32.mrb[9].mxu1 }
 0x5ec   :  { %vm528_vm10 = vcmp.gt.f32.partialorder %v525_v58, 0.0  ;;  %v529_v60 = vmul.f32 0.01, %v525_v58 }
 0x5ee   :  { %v530_v61 = vsel %vm528_vm10, %v525_v58, %v529_v60 }
 0x5ef   :  { %713 = vmatmul.mubr.msk.f32.vlgmr.msra.gmra.mrb[8].mxu0 %vm454_vm9, %v530_v61 }
 0x6c2   :  { %v603_v63 = vpop.f32.mrb[8].mxu0 }
 0x6c3   :  { %v604_v0 = vadd.f32 %v603_v63, %v532_v62  ;;  %v714_v1 = vpop.f32.mrb[9].mxu0 }
 0x6c5   :  { %608 = vst.msk [vmem:[#allocation2] sm:$0x3] %vm607_vm11, %v604_v0 }
 0x6c6   :  { %752 = shalt.err (!%p749_p4)
}
 0x6c7   :  { %s753_s28 = scalar_lea.hbm %s913_s5, 32 }
 0x6c8   :  { %p754_p5 = scmp.ne.s32.totalorder %s913_s5, %s753_s28  ;;  %p757_p6 = scmp.lt.u32.totalorder %s753_s28, %s913_s5 }
 0x6ca   :  { %p759_p7 = pnand %p757_p6, %p754_p5 }
 0x6cc   :  { %762 = shalt.err (!%p759_p7)
}
 0x6cd   :  { %618 = dma.vmem_to_hbm [thread:$0]  %s616_s26, 32, %s913_s5, [#allocation3]  }
 0x6ce   :  { %763 = dma.done.wait [#allocation3], 32  }
 0x6cf   :  { %764 = vsyncadd [#allocation3], 4294967264 }
 0x6d0   :  { %622 = vsyncpa [#allocation3], 1 }

</bundles_post_ra>
